<compile_context>
chip_gen: v6e
topology: v6e:2x2x1
jax: 0.10.0
libtpu: 0.0.40
codegen_flags: <defaults>
</compile_context>

<pallas_src>
import functools

import jax
import jax.numpy as jnp
from jax.experimental import pallas as pl
from jax.experimental.pallas import tpu as pltpu


def _vae_kernel(x_ref, eps_ref,
                w_enc_ref, b_enc_ref,
                w_lat_ref, b_lat_ref,
                w_dec_ref, b_dec_ref,
                w_dmu_ref, b_dmu_ref,
                out_ref, *, latent_dim):
    x = x_ref[...]                      # (TB, D_in)  f32
    eps = eps_ref[...]                  # (TB, D_lat) f32

    # ---------------- encoder ----------------
    h = jnp.dot(x.astype(jnp.bfloat16), w_enc_ref[...],
                preferred_element_type=jnp.float32) + b_enc_ref[...]
    h = jnp.maximum(h, 0.0)             # relu

    # fused mu/logvar head: (TB, 2*latent)
    lat = jnp.dot(h.astype(jnp.bfloat16), w_lat_ref[...],
                  preferred_element_type=jnp.float32) + b_lat_ref[...]
    mu_e = lat[:, :latent_dim]
    logvar_e = lat[:, latent_dim:]

    # reparameterization: z = mu + exp(0.5*logvar) * eps   (single exp)
    std = jnp.exp(0.5 * logvar_e)
    var = std * std                     # reused by KL, no second exp
    z = mu_e + std * eps

    # ---------------- decoder ----------------
    h2 = jnp.dot(z.astype(jnp.bfloat16), w_dec_ref[...],
                 preferred_element_type=jnp.float32) + b_dec_ref[...]
    h2 = jnp.maximum(h2, 0.0)           # relu

    logits = jnp.dot(h2.astype(jnp.bfloat16), w_dmu_ref[...],
                     preferred_element_type=jnp.float32) + b_dmu_ref[...]

    # ---------------- losses -----------------
    # BCE(sum) on sigmoid(logits) vs x, computed from logits with one stable
    # softplus; keep torch BCELoss' clamp of log terms at -100.
    sp = jnp.maximum(logits, 0.0) + jnp.log1p(jnp.exp(-jnp.abs(logits)))
    log_p = jnp.maximum(logits - sp, -100.0)      # log sigmoid(logits)
    log_1mp = jnp.maximum(-sp, -100.0)            # log(1 - sigmoid(logits))
    neg_cross_entropy = -(jnp.sum(x * (log_p - log_1mp)) + jnp.sum(log_1mp))

    kl_div = -0.5 * jnp.sum(1.0 + logvar_e - mu_e * mu_e - var)

    total = neg_cross_entropy + kl_div
    # Lane-dense (1, 128) partial-loss block (unmasked vst); wrapper reads [:, 0].
    out_ref[...] = jnp.full((1, 128), total, jnp.float32)


def bernoulli_vae_neg_elbo(x, eps, params, *, batch_tile=None):
    """Negative ELBO.  params: bf16 (fan_in, fan_out) weights, f32 (1, fan_out) biases."""
    B, d_in = x.shape
    latent_dim = eps.shape[1]

    if batch_tile is None:
        # 256 fills the 256-wide MXU M dim on v6e/v7x (128 suffices on v5e).
        # Keep TB modest so double-buffered x/eps tiles + resident weights stay
        # well under v7x's 64 MiB VMEM.
        batch_tile = min(B, 256)
    assert B % batch_tile == 0, "batch must be divisible by the batch tile"
    num_tiles = B // batch_tile

    operands = (
        x, eps,
        params["w_enc"], params["b_enc"],
        params["w_lat"], params["b_lat"],
        params["w_dec"], params["b_dec"],
        params["w_dmu"], params["b_dmu"],
    )

    def resident_spec(a):
        # Weights/biases: full block, constant index_map -> DMA'd once, stay in VMEM.
        shp = a.shape
        return pl.BlockSpec(shp, lambda i, _n=len(shp): (0,) * _n)

    in_specs = [
        pl.BlockSpec((batch_tile, d_in), lambda i: (i, 0)),        # x tile
        pl.BlockSpec((batch_tile, latent_dim), lambda i: (i, 0)),  # eps tile
    ] + [resident_spec(a) for a in operands[2:]]

    partials = pl.pallas_call(
        functools.partial(_vae_kernel, latent_dim=latent_dim),
        out_shape=jax.ShapeDtypeStruct((num_tiles, 128), jnp.float32),
        grid=(num_tiles,),
        in_specs=in_specs,
        out_specs=pl.BlockSpec((1, 128), lambda i: (i, 0)),
        compiler_params=pltpu.CompilerParams(
            # per-tile partials (no accumulator) => batch axis can shard across
            # v7x's two TensorCores; harmless on v5e/v6e.
            dimension_semantics=("parallel",)),
    )(*operands)

    return jnp.sum(partials[:, 0])


def init_params(key, input_dim, latent_dim, enc_units, dec_units):
    """nn.Linear-style init U(-1/sqrt(fan_in), 1/sqrt(fan_in)).

    mu / logvar heads are fused into one (enc_units, 2*latent) weight
    (mu columns first, logvar columns second).  Weights stored as bf16
    (MXU-native), biases as f32.
    """
    keys = jax.random.split(key, 12)

    def linear(kw, kb, fan_in, fan_out):
        bound = 1.0 / jnp.sqrt(jnp.float32(fan_in))
        w = jax.random.uniform(kw, (fan_in, fan_out), jnp.float32, -bound, bound)
        b = jax.random.uniform(kb, (1, fan_out), jnp.float32, -bound, bound)
        return w, b

    w_enc, b_enc = linear(keys[0], keys[1], input_dim, enc_units)
    w_mu, b_mu = linear(keys[2], keys[3], enc_units, latent_dim)
    w_lv, b_lv = linear(keys[4], keys[5], enc_units, latent_dim)
    w_dec, b_dec = linear(keys[6], keys[7], latent_dim, dec_units)
    w_dmu, b_dmu = linear(keys[8], keys[9], dec_units, input_dim)

    w_lat = jnp.concatenate([w_mu, w_lv], axis=1)      # (enc, 2*latent)
    b_lat = jnp.concatenate([b_mu, b_lv], axis=1)      # (1, 2*latent)

    bf = jnp.bfloat16
    return {
        "w_enc": w_enc.astype(bf), "b_enc": b_enc,
        "w_lat": w_lat.astype(bf), "b_lat": b_lat,
        "w_dec": w_dec.astype(bf), "b_dec": b_dec,
        "w_dmu": w_dmu.astype(bf), "b_dmu": b_dmu,
    }


if __name__ == "__main__":
    # Small shapes consistent with the module's forward (flattened images).
    batch = 8
    input_dim = 256     # stand-in for 28*28 at small scale
    latent_dim = 32
    enc_units = 128
    dec_units = 128

    key = jax.random.PRNGKey(0)
    k_x, k_eps, k_params = jax.random.split(key, 3)

    # Bernoulli-style input in [0, 1]
    x = jax.random.uniform(k_x, (batch, input_dim), jnp.float32, 0.0, 1.0)
    # epsilon ~ N(0, I)  (MultivariateNormal(zeros, eye) == standard normal).
    # TODO(synk): could be generated in-kernel with pltpu.prng_seed +
    # pltpu.stateful_normal to drop one input DMA (breaks bit-parity with this ref).
    eps = jax.random.normal(k_eps, (batch, latent_dim), jnp.float32)

    params = init_params(k_params, input_dim, latent_dim, enc_units, dec_units)

    loss = bernoulli_vae_neg_elbo(x, eps, params)
    jax.block_until_ready(loss)

    # Pure-JAX reference mirroring the kernel math (bf16 MXU inputs, f32 math).
    def ref(x, eps, p, latent):
        def bdot(a, w):
            return jnp.dot(a.astype(jnp.bfloat16), w,
                           preferred_element_type=jnp.float32)
        h = jnp.maximum(bdot(x, p["w_enc"]) + p["b_enc"], 0.0)
        lat = bdot(h, p["w_lat"]) + p["b_lat"]
        mu_e, lv = lat[:, :latent], lat[:, latent:]
        std = jnp.exp(0.5 * lv)
        z = mu_e + std * eps
        h2 = jnp.maximum(bdot(z, p["w_dec"]) + p["b_dec"], 0.0)
        logits = bdot(h2, p["w_dmu"]) + p["b_dmu"]
        sp = jnp.maximum(logits, 0.0) + jnp.log1p(jnp.exp(-jnp.abs(logits)))
        log_p = jnp.maximum(logits - sp, -100.0)
        log_1mp = jnp.maximum(-sp, -100.0)
        bce = -(jnp.sum(x * (log_p - log_1mp)) + jnp.sum(log_1mp))
        kl = -0.5 * jnp.sum(1.0 + lv - mu_e * mu_e - std * std)
        return bce + kl

    ref_loss = ref(x, eps, params, latent_dim)
    assert jnp.allclose(loss, ref_loss, rtol=5e-3, atol=1e-1), (loss, ref_loss)

    print("KERNEL_OK")
</pallas_src>

<mosaic_0001>
module attributes {stable_mosaic.version = 11 : i64} {
  func.func @_vae_kernel(%arg0: i32, %arg1: memref<8x256xf32, #tpu.memory_space<vmem>>, %arg2: memref<8x32xf32, #tpu.memory_space<vmem>>, %arg3: memref<256x128xbf16, #tpu.memory_space<vmem>>, %arg4: memref<1x128xf32, #tpu.memory_space<vmem>>, %arg5: memref<128x64xbf16, #tpu.memory_space<vmem>>, %arg6: memref<1x64xf32, #tpu.memory_space<vmem>>, %arg7: memref<32x128xbf16, #tpu.memory_space<vmem>>, %arg8: memref<1x128xf32, #tpu.memory_space<vmem>>, %arg9: memref<128x256xbf16, #tpu.memory_space<vmem>>, %arg10: memref<1x256xf32, #tpu.memory_space<vmem>>, %arg11: memref<1x128xf32, #tpu.memory_space<vmem>>) attributes {dimension_semantics = [#tpu.dimension_semantics<parallel>], iteration_bounds = array<i64: 1>, scalar_prefetch = 0 : i64, scratch_operands = 0 : i64, tpu.core_type = #tpu.core_type<tc>, window_params = [{transform_indices = @transform_0, window_bounds = array<i64: 8, 256>}, {transform_indices = @transform_1, window_bounds = array<i64: 8, 32>}, {pipeline_mode = #tpu.pipeline_mode<synchronous>, transform_indices = @transform_2, window_bounds = array<i64: 256, 128>}, {pipeline_mode = #tpu.pipeline_mode<synchronous>, transform_indices = @transform_3, window_bounds = array<i64: 1, 128>}, {pipeline_mode = #tpu.pipeline_mode<synchronous>, transform_indices = @transform_4, window_bounds = array<i64: 128, 64>}, {pipeline_mode = #tpu.pipeline_mode<synchronous>, transform_indices = @transform_5, window_bounds = array<i64: 1, 64>}, {pipeline_mode = #tpu.pipeline_mode<synchronous>, transform_indices = @transform_6, window_bounds = array<i64: 32, 128>}, {pipeline_mode = #tpu.pipeline_mode<synchronous>, transform_indices = @transform_7, window_bounds = array<i64: 1, 128>}, {pipeline_mode = #tpu.pipeline_mode<synchronous>, transform_indices = @transform_8, window_bounds = array<i64: 128, 256>}, {pipeline_mode = #tpu.pipeline_mode<synchronous>, transform_indices = @transform_9, window_bounds = array<i64: 1, 256>}, {transform_indices = @transform_10, window_bounds = array<i64: 1, 128>}]} {
    %c0 = arith.constant 0 : index
    %c0_0 = arith.constant 0 : index
    %0 = vector.load %arg1[%c0, %c0_0] : memref<8x256xf32, #tpu.memory_space<vmem>>, vector<8x256xf32>
    %c0_1 = arith.constant 0 : index
    %c0_2 = arith.constant 0 : index
    %1 = vector.load %arg2[%c0_1, %c0_2] : memref<8x32xf32, #tpu.memory_space<vmem>>, vector<8x32xf32>
    %2 = arith.truncf %0 : vector<8x256xf32> to vector<8x256xbf16>
    %c0_3 = arith.constant 0 : index
    %c0_4 = arith.constant 0 : index
    %3 = vector.load %arg3[%c0_3, %c0_4] : memref<256x128xbf16, #tpu.memory_space<vmem>>, vector<256x128xbf16>
    %cst = arith.constant dense<0.000000e+00> : vector<8x128xf32>
    %4 = tpu.matmul %2, %3, %cst {dimension_numbers = #tpu.dot_dimension_numbers<[1], [0], [0], [1], [0, 0, 1, 1], [], []>} : vector<8x256xbf16>, vector<256x128xbf16>, vector<8x128xf32> -> vector<8x128xf32>
    %c0_5 = arith.constant 0 : index
    %c0_6 = arith.constant 0 : index
    %5 = vector.load %arg4[%c0_5, %c0_6] : memref<1x128xf32, #tpu.memory_space<vmem>>, vector<1x128xf32>
    %6 = vector.broadcast %5 : vector<1x128xf32> to vector<8x128xf32>
    %7 = arith.addf %4, %6 : vector<8x128xf32>
    %cst_7 = arith.constant 0.000000e+00 : f32
    %8 = vector.broadcast %cst_7 : f32 to vector<8x128xf32>
    %9 = arith.maximumf %7, %8 : vector<8x128xf32>
    %10 = arith.truncf %9 : vector<8x128xf32> to vector<8x128xbf16>
    %c0_8 = arith.constant 0 : index
    %c0_9 = arith.constant 0 : index
    %11 = vector.load %arg5[%c0_8, %c0_9] : memref<128x64xbf16, #tpu.memory_space<vmem>>, vector<128x64xbf16>
    %cst_10 = arith.constant dense<0.000000e+00> : vector<8x64xf32>
    %12 = tpu.matmul %10, %11, %cst_10 {dimension_numbers = #tpu.dot_dimension_numbers<[1], [0], [0], [1], [0, 0, 1, 1], [], []>} : vector<8x128xbf16>, vector<128x64xbf16>, vector<8x64xf32> -> vector<8x64xf32>
    %c0_11 = arith.constant 0 : index
    %c0_12 = arith.constant 0 : index
    %13 = vector.load %arg6[%c0_11, %c0_12] : memref<1x64xf32, #tpu.memory_space<vmem>>, vector<1x64xf32>
    %14 = vector.broadcast %13 : vector<1x64xf32> to vector<8x64xf32>
    %15 = arith.addf %12, %14 : vector<8x64xf32>
    %16 = vector.extract_strided_slice %15 {offsets = [0, 0], sizes = [8, 32], strides = [1, 1]} : vector<8x64xf32> to vector<8x32xf32>
    %17 = vector.extract_strided_slice %15 {offsets = [0, 32], sizes = [8, 32], strides = [1, 1]} : vector<8x64xf32> to vector<8x32xf32>
    %cst_13 = arith.constant 5.000000e-01 : f32
    %18 = vector.broadcast %cst_13 : f32 to vector<8x32xf32>
    %19 = arith.mulf %18, %17 : vector<8x32xf32>
    %20 = math.exp %19 : vector<8x32xf32>
    %21 = arith.mulf %20, %20 : vector<8x32xf32>
    %22 = arith.mulf %20, %1 : vector<8x32xf32>
    %23 = arith.addf %16, %22 : vector<8x32xf32>
    %24 = arith.truncf %23 : vector<8x32xf32> to vector<8x32xbf16>
    %c0_14 = arith.constant 0 : index
    %c0_15 = arith.constant 0 : index
    %25 = vector.load %arg7[%c0_14, %c0_15] : memref<32x128xbf16, #tpu.memory_space<vmem>>, vector<32x128xbf16>
    %cst_16 = arith.constant dense<0.000000e+00> : vector<8x128xf32>
    %26 = tpu.matmul %24, %25, %cst_16 {dimension_numbers = #tpu.dot_dimension_numbers<[1], [0], [0], [1], [0, 0, 1, 1], [], []>} : vector<8x32xbf16>, vector<32x128xbf16>, vector<8x128xf32> -> vector<8x128xf32>
    %c0_17 = arith.constant 0 : index
    %c0_18 = arith.constant 0 : index
    %27 = vector.load %arg8[%c0_17, %c0_18] : memref<1x128xf32, #tpu.memory_space<vmem>>, vector<1x128xf32>
    %28 = vector.broadcast %27 : vector<1x128xf32> to vector<8x128xf32>
    %29 = arith.addf %26, %28 : vector<8x128xf32>
    %cst_19 = arith.constant 0.000000e+00 : f32
    %30 = vector.broadcast %cst_19 : f32 to vector<8x128xf32>
    %31 = arith.maximumf %29, %30 : vector<8x128xf32>
    %32 = arith.truncf %31 : vector<8x128xf32> to vector<8x128xbf16>
    %c0_20 = arith.constant 0 : index
    %c0_21 = arith.constant 0 : index
    %33 = vector.load %arg9[%c0_20, %c0_21] : memref<128x256xbf16, #tpu.memory_space<vmem>>, vector<128x256xbf16>
    %cst_22 = arith.constant dense<0.000000e+00> : vector<8x256xf32>
    %34 = tpu.matmul %32, %33, %cst_22 {dimension_numbers = #tpu.dot_dimension_numbers<[1], [0], [0], [1], [0, 0, 1, 1], [], []>} : vector<8x128xbf16>, vector<128x256xbf16>, vector<8x256xf32> -> vector<8x256xf32>
    %c0_23 = arith.constant 0 : index
    %c0_24 = arith.constant 0 : index
    %35 = vector.load %arg10[%c0_23, %c0_24] : memref<1x256xf32, #tpu.memory_space<vmem>>, vector<1x256xf32>
    %36 = vector.broadcast %35 : vector<1x256xf32> to vector<8x256xf32>
    %37 = arith.addf %34, %36 : vector<8x256xf32>
    %cst_25 = arith.constant 0.000000e+00 : f32
    %38 = vector.broadcast %cst_25 : f32 to vector<8x256xf32>
    %39 = arith.maximumf %37, %38 : vector<8x256xf32>
    %40 = math.absf %37 : vector<8x256xf32>
    %cst_26 = arith.constant 0.000000e+00 : f32
    %41 = vector.broadcast %cst_26 : f32 to vector<8x256xf32>
    %42 = arith.subf %41, %40 : vector<8x256xf32>
    %43 = math.exp %42 : vector<8x256xf32>
    %44 = math.log1p %43 : vector<8x256xf32>
    %45 = arith.addf %39, %44 : vector<8x256xf32>
    %46 = arith.subf %37, %45 : vector<8x256xf32>
    %cst_27 = arith.constant -1.000000e+02 : f32
    %47 = vector.broadcast %cst_27 : f32 to vector<8x256xf32>
    %48 = arith.maximumf %46, %47 : vector<8x256xf32>
    %cst_28 = arith.constant 0.000000e+00 : f32
    %49 = vector.broadcast %cst_28 : f32 to vector<8x256xf32>
    %50 = arith.subf %49, %45 : vector<8x256xf32>
    %cst_29 = arith.constant -1.000000e+02 : f32
    %51 = vector.broadcast %cst_29 : f32 to vector<8x256xf32>
    %52 = arith.maximumf %50, %51 : vector<8x256xf32>
    %53 = arith.subf %48, %52 : vector<8x256xf32>
    %54 = arith.mulf %0, %53 : vector<8x256xf32>
    %55 = vector.shape_cast %54 : vector<8x256xf32> to vector<1x8x256xf32>
    %cst_30 = arith.constant dense<0.000000e+00> : vector<1xf32>
    %56 = vector.multi_reduction <add>, %55, %cst_30 [1, 2] : vector<1x8x256xf32> to vector<1xf32>
    %57 = vector.shape_cast %56 : vector<1xf32> to vector<1x1x1xf32>
    %58 = vector.extract %57[0, 0, 0] : f32 from vector<1x1x1xf32>
    %59 = vector.shape_cast %52 : vector<8x256xf32> to vector<1x8x256xf32>
    %cst_31 = arith.constant dense<0.000000e+00> : vector<1xf32>
    %60 = vector.multi_reduction <add>, %59, %cst_31 [1, 2] : vector<1x8x256xf32> to vector<1xf32>
    %61 = vector.shape_cast %60 : vector<1xf32> to vector<1x1x1xf32>
    %62 = vector.extract %61[0, 0, 0] : f32 from vector<1x1x1xf32>
    %63 = arith.addf %58, %62 : f32
    %cst_32 = arith.constant 0.000000e+00 : f32
    %64 = arith.subf %cst_32, %63 : f32
    %cst_33 = arith.constant 1.000000e+00 : f32
    %65 = vector.broadcast %cst_33 : f32 to vector<8x32xf32>
    %66 = arith.addf %65, %17 : vector<8x32xf32>
    %67 = arith.mulf %16, %16 : vector<8x32xf32>
    %68 = arith.subf %66, %67 : vector<8x32xf32>
    %69 = arith.subf %68, %21 : vector<8x32xf32>
    %70 = vector.shape_cast %69 : vector<8x32xf32> to vector<1x8x32xf32>
    %cst_34 = arith.constant dense<0.000000e+00> : vector<1xf32>
    %71 = vector.multi_reduction <add>, %70, %cst_34 [1, 2] : vector<1x8x32xf32> to vector<1xf32>
    %72 = vector.shape_cast %71 : vector<1xf32> to vector<1x1x1xf32>
    %73 = vector.extract %72[0, 0, 0] : f32 from vector<1x1x1xf32>
    %cst_35 = arith.constant -5.000000e-01 : f32
    %74 = arith.mulf %cst_35, %73 : f32
    %75 = arith.addf %64, %74 : f32
    %76 = vector.broadcast %75 : f32 to vector<1x128xf32>
    %c0_36 = arith.constant 0 : index
    %c0_37 = arith.constant 0 : index
    %77 = vector.load %arg11[%c0_36, %c0_37] : memref<1x128xf32, #tpu.memory_space<vmem>>, vector<1x128xf32>
    tpu.vector_store %arg11[%c0_36, %c0_37], %76 {strides = array<i32>} : memref<1x128xf32, #tpu.memory_space<vmem>>, vector<1x128xf32>,
    return
  }
  func.func @transform_0(%arg0: i32) -> (i32, i32) {
    %c0_i32 = arith.constant 0 : i32
    %c0_i32_0 = arith.constant 0 : i32
    return %arg0, %c0_i32 : i32, i32
  }
  func.func @transform_1(%arg0: i32) -> (i32, i32) {
    %c0_i32 = arith.constant 0 : i32
    %c0_i32_0 = arith.constant 0 : i32
    return %arg0, %c0_i32 : i32, i32
  }
  func.func @transform_2(%arg0: i32) -> (i32, i32) {
    %c0_i32 = arith.constant 0 : i32
    %c0_i32_0 = arith.constant 0 : i32
    %c0_i32_1 = arith.constant 0 : i32
    return %c0_i32, %c0_i32_0 : i32, i32
  }
  func.func @transform_3(%arg0: i32) -> (i32, i32) {
    %c0_i32 = arith.constant 0 : i32
    %c0_i32_0 = arith.constant 0 : i32
    %c0_i32_1 = arith.constant 0 : i32
    return %c0_i32, %c0_i32_0 : i32, i32
  }
  func.func @transform_4(%arg0: i32) -> (i32, i32) {
    %c0_i32 = arith.constant 0 : i32
    %c0_i32_0 = arith.constant 0 : i32
    %c0_i32_1 = arith.constant 0 : i32
    return %c0_i32, %c0_i32_0 : i32, i32
  }
  func.func @transform_5(%arg0: i32) -> (i32, i32) {
    %c0_i32 = arith.constant 0 : i32
    %c0_i32_0 = arith.constant 0 : i32
    %c0_i32_1 = arith.constant 0 : i32
    return %c0_i32, %c0_i32_0 : i32, i32
  }
  func.func @transform_6(%arg0: i32) -> (i32, i32) {
    %c0_i32 = arith.constant 0 : i32
    %c0_i32_0 = arith.constant 0 : i32
    %c0_i32_1 = arith.constant 0 : i32
    return %c0_i32, %c0_i32_0 : i32, i32
  }
  func.func @transform_7(%arg0: i32) -> (i32, i32) {
    %c0_i32 = arith.constant 0 : i32
    %c0_i32_0 = arith.constant 0 : i32
    %c0_i32_1 = arith.constant 0 : i32
    return %c0_i32, %c0_i32_0 : i32, i32
  }
  func.func @transform_8(%arg0: i32) -> (i32, i32) {
    %c0_i32 = arith.constant 0 : i32
    %c0_i32_0 = arith.constant 0 : i32
    %c0_i32_1 = arith.constant 0 : i32
    return %c0_i32, %c0_i32_0 : i32, i32
  }
  func.func @transform_9(%arg0: i32) -> (i32, i32) {
    %c0_i32 = arith.constant 0 : i32
    %c0_i32_0 = arith.constant 0 : i32
    %c0_i32_1 = arith.constant 0 : i32
    return %c0_i32, %c0_i32_0 : i32, i32
  }
  func.func @transform_10(%arg0: i32) -> (i32, i32) {
    %c0_i32 = arith.constant 0 : i32
    %c0_i32_0 = arith.constant 0 : i32
    return %arg0, %c0_i32 : i32, i32
  }
}

</mosaic_0001>

<bundles_post_ra>
// kernel: tpu_custom_call.1
= control target key start
LH: loop header
LB: loop body
LE: loop exit
PB: predicated region body
PF: predicated region fallthrough
CT: control target
= control target key end

     0   :  { %15 = vsyncpa [#allocation3], 0  ;;  %s1100_s0 = inlined_call_operand.vmem [shape: f32[8,256], index: 0, kind: input, shape index: {}]   ;;  %s1101_s1 = inlined_call_operand.vmem [shape: f32[8,32], index: 1, kind: input, shape index: {}]   ;;  %s1102_s2 = inlined_call_operand.hbm [shape: bf16[256,128], index: 2, kind: input, shape index: {}]   ;;  %s1103_s3 = inlined_call_operand.vmem [shape: f32[1,128], index: 3, kind: input, shape index: {}]   ;;  %s1104_s4 = inlined_call_operand.vmem [shape: bf16[128,64], index: 4, kind: input, shape index: {}]   ;;  %s1105_s5 = inlined_call_operand.vmem [shape: f32[1,64], index: 5, kind: input, shape index: {}]   ;;  %s1106_s6 = inlined_call_operand.vmem [shape: bf16[32,128], index: 6, kind: input, shape index: {}]   ;;  %s1107_s7 = inlined_call_operand.vmem [shape: f32[1,128], index: 7, kind: input, shape index: {}]   ;;  %s1108_s8 = inlined_call_operand.hbm [shape: bf16[128,256], index: 8, kind: input, shape index: {}]   ;;  %s1109_s9 = inlined_call_operand.vmem [shape: f32[1,256], index: 9, kind: input, shape index: {}]   ;;  %s1110_s10 = inlined_call_operand.hbm [shape: f32[1,128], index: 10, kind: output, shape index: {}]  }
   0x1   :  { %16 = vsyncpa [#allocation6], 0 }
   0x2   :  { %17 = vsyncpa [#allocation4], 0  ;;  %s949_s13 = smov [#allocation2]  }
   0x3   :  { %s27_s14 = sshll.u32 %s949_s13, 4  ;;  %s28_s14 = int_to_ptr.vmem [resolvable:$true] %s27_s14 }
   0x4   :  { %s891_s15 = scalar_lea.vmem %s28_s14, 2048  ;;  %p896_p1 = scmp.lt.s32.totalorder %s28_s14, %s28_s14 }
   0x5   :  { %p892_p0 = scmp.ne.s32.totalorder %s28_s14, %s891_s15  ;;  %p897_p2 = scmp.lt.s32.totalorder %s891_s15, %s891_s15 }
   0x7   :  { %p898_p3 = por %p897_p2, %p896_p1 }
   0x9   :  { %p899_p4 = pnand %p898_p3, %p892_p0 }
   0xb   :  { %902 = shalt.err (!%p899_p4)
}
   0xc   :  { %s950_s16 = smov 64   ;;  %s951_s17 = smov 4  }
   0xd   :  { %33 = dma.hbm_to_vmem [thread:$0]  %s1102_s2, 2048, %s28_s14, [#allocation3], %s950_s16, %s950_s16, %s951_s17  }
   0xe   :  { %s952_s20 = smov [#allocation5]  }
   0xf   :  { %s49_s21 = sshll.u32 %s952_s20, 4  ;;  %s50_s21 = int_to_ptr.vmem [resolvable:$true] %s49_s21 }
  0x10   :  { %s911_s22 = scalar_lea.vmem %s50_s21, 2048  ;;  %p916_p6 = scmp.lt.s32.totalorder %s50_s21, %s50_s21 }
  0x11   :  { %p912_p5 = scmp.ne.s32.totalorder %s50_s21, %s911_s22  ;;  %p917_p7 = scmp.lt.s32.totalorder %s911_s22, %s911_s22 }
  0x13   :  { %p918_p8 = por %p917_p7, %p916_p6 }
  0x15   :  { %p919_p9 = pnand %p918_p8, %p912_p5 }
  0x17   :  { %922 = shalt.err (!%p919_p9)
}
  0x18   :  { %s953_s23 = smov 128   ;;  %s954_s24 = smov 8  }
  0x19   :  { %55 = dma.hbm_to_vmem [thread:$0]  %s1108_s8, 2048, %s50_s21, [#allocation6], %s953_s23, %s953_s23, %s954_s24  }
  0x1a   :  { %943 = dma.done.wait [#allocation3], 2048  }
  0x1b   :  { %944 = vsyncadd [#allocation3], 4294965248 }
  0x1c   :  { %945 = dma.done.wait [#allocation6], 2048  }
  0x1d   :  { %946 = vsyncadd [#allocation6], 4294965248  ;;  %v955_v0 = vmov 0.0   ;;  %v823_v1 = vld [vmem:[#allocation2 + $0x78] sm:$0xff]   ;;  %v825_v3 = vld [vmem:[#allocation2 + $0x70] sm:$0xff]   ;;  %vm956_vm0 = vmmov 0  }
  0x1e   :  { %777 = vmatprep.subr.bf16.mxu1 %v955_v0  ;;  %v824_v2 = vld [vmem:[#allocation2 + $0x38] sm:$0xff]   ;;  %743 = vmatprep.subr.bf16.mxu0 %v823_v1  ;;  %v826_v4 = vld [vmem:[#allocation2 + $0x30] sm:$0xff]   ;;  %v827_v5 = vld [vmem:[#allocation2 + $0x68] sm:$0xff]   ;;  %s957_s26 = smov 32   ;;  %vm396_vm1 = vcmask 261120   ;;  %s960_s15 = smov [#allocation7]  }
  0x1f   :  { %744 = vmatpush3.bf16.msra.mxu0 %v824_v2  ;;  %v828_v6 = vld [vmem:[#allocation2 + $0x28] sm:$0xff]   ;;  %v829_v7 = vld [vmem:[#allocation2 + $0x60] sm:$0xff]   ;;  %v831_v9 = vld [vmem:[#allocation2 + $0x58] sm:$0xff]   ;;  %793 = vmatprep.mubr.msk.bf16.mxu1 %vm956_vm0, %v955_v0  ;;  %s687_s16 = sshll.u32 %s960_s15, 4  ;;  %s688_s16 = int_to_ptr.vmem [resolvable:$true] %s687_s16 }
  0x20   :  { %745 = vmatprep.subr.bf16.mxu0 %v825_v3  ;;  %v830_v8 = vld [vmem:[#allocation2 + $0x20] sm:$0xff]   ;;  %v832_v10 = vld [vmem:[#allocation2 + $0x18] sm:$0xff]   ;;  %v833_v11 = vld [vmem:[#allocation2 + $0x50] sm:$0xff]   ;;  %s923_s19 = scalar_lea.vmem %s688_s16, 16  ;;  %s927_s20 = scalar_lea.vmem %s688_s16, 32 }
  0x21   :  { %v1026_v12 = vld [vmem:[%s1100_s0 + $0x8] sm:$0xff]  ;;  %v839_v14 = vld [vmem:[%s1104_s4 + $0x38] sm:$0xff]   ;;  %v834_v15 = vld [vmem:[#allocation2 + $0x10] sm:$0xff]   ;;  %p924_p10 = scmp.ne.s32.totalorder %s688_s16, %s923_s19  ;;  %p928_p11 = scmp.lt.s32.totalorder %s688_s16, %s688_s16 }
  0x22   :  { %v69_v13 = vpack.c.bf16 %v1026_v12, %v1026_v12  ;;  %v835_v16 = vld [vmem:[#allocation2 + $0x48] sm:$0xff]   ;;  %778 = vmatpush3.bf16.msra.mxu1 %v839_v14  ;;  %v840_v17 = vld [vmem:[%s1104_s4 + $0x30] sm:$0xff]   ;;  %v837_v19 = vld [vmem:[#allocation2 + $0x40] sm:$0xff]   ;;  %v959_v14 = vmov 0   ;;  %p929_p12 = scmp.lt.s32.totalorder %s927_s20, %s923_s19 }
  0x23   :  { %746 = vmatpush3.bf16.msra.mxu0 %v826_v4  ;;  %v836_v18 = vld [vmem:[#allocation2 + $0x8] sm:$0xff]   ;;  %779 = vmatprep.subr.bf16.mxu1 %v955_v0  ;;  %v838_v21 = vld [vmem:[#allocation2] sm:$0xff]   ;;  %v843_v25 = vld [vmem:[%s1104_s4 + $0x18] sm:$0xff]  }
  0x24   :  { %747 = vmatprep.subr.bf16.mxu0 %v827_v5  ;;  %237 = vmatprep.mubr.bf16.mxu0 %v69_v13  ;;  %v841_v20 = vld [vmem:[%s1104_s4 + $0x28] sm:$0xff]   ;;  %v1043_v22 = vld [vmem:[%s1100_s0] sm:$0xff]  ;;  %v844_v26 = vld [vmem:[%s1104_s4 + $0x10] sm:$0xff]   ;;  %p930_p13 = por %p929_p12, %p928_p11 }
  0x25   :  { %v842_v23 = vld [vmem:[%s1104_s4 + $0x20] sm:$0xff]   ;;  %v68_v24 = vpack.c.bf16 %v1043_v22, %v1043_v22  ;;  %v845_v27 = vld [vmem:[%s1104_s4 + $0x8] sm:$0xff]   ;;  %v849_v53 = vld [vmem:[#allocation5 + $0x70] ss:$8 sps:$4 sm:$0xff]  }
  0x26   :  { %780 = vmatpush3.bf16.msra.mxu1 %v840_v17  ;;  %v846_v28 = vld [vmem:[%s1104_s4] sm:$0xff]   ;;  %v847_v39 = vld [vmem:[%s1106_s6 + $0x8] sm:$0xff]   ;;  %v851_v54 = vld [vmem:[#allocation5 + $0x74] ss:$8 sps:$4 sm:$0xff]   ;;  %p931_p0 = pnand %p930_p13, %p924_p10 }
  0x27   :  { %748 = vmatpush3.bf16.msra.mxu0 %v828_v6  ;;  %781 = vmatprep.subr.bf16.mxu1 %v955_v0  ;;  %v67_v29 = vld [vmem:[%s1101_s1] sm:$0xff]  ;;  %v857_v57 = vld [vmem:[#allocation5 + $0x54] ss:$8 sps:$4 sm:$0xff]   ;;  %v855_v58 = vld [vmem:[#allocation5 + $0x50] ss:$8 sps:$4 sm:$0xff]  }
  0x28   :  { %749 = vmatprep.subr.bf16.mxu0 %v829_v7  ;;  %363 = vrot.lane.b32.xlu0 %v67_v29, %s957_s26  ;;  %v697_v31 = vld [vmem:[%s1103_s3] ss:$0 sm:$0xff]  ;;  %v854_v55 = vld [vmem:[#allocation5 + $0x64] ss:$8 sps:$4 sm:$0xff]   ;;  %v863_v2 = vld [vmem:[#allocation5 + $0x34] ss:$8 sps:$4 sm:$0xff]  }
  0x29   :  { %v714_v40 = vld [vmem:[%s1105_s5] ss:$0 sm:$0xff]  ;;  %s958_s5 = smov 96   ;;  %v860_v60 = vld [vmem:[#allocation5 + $0x44] ss:$8 sps:$4 sm:$0xff]  }
  0x2a   :  { %782 = vmatpush3.bf16.msra.mxu1 %v841_v20  ;;  %v848_v49 = vld [vmem:[%s1106_s6] sm:$0xff]   ;;  %v861_v3 = vld [vmem:[#allocation5 + $0x30] ss:$8 sps:$4 sm:$0xff]   ;;  %v869_v6 = vld [vmem:[#allocation5 + $0x14] ss:$8 sps:$4 sm:$0xff]  }
  0x2b   :  { %750 = vmatpush3.bf16.msra.mxu0 %v830_v8  ;;  %783 = vmatprep.subr.bf16.mxu1 %v955_v0  ;;  %v852_v56 = vld [vmem:[#allocation5 + $0x60] ss:$8 sps:$4 sm:$0xff]   ;;  %v866_v4 = vld [vmem:[#allocation5 + $0x24] ss:$8 sps:$4 sm:$0xff]   ;;  %v867_v7 = vld [vmem:[#allocation5 + $0x10] ss:$8 sps:$4 sm:$0xff]  }
  0x2c   :  { %751 = vmatprep.subr.bf16.mxu0 %v831_v9  ;;  %v864_v5 = vld [vmem:[#allocation5 + $0x20] ss:$8 sps:$4 sm:$0xff]  }
  0x2d   :  { %v870_v13 = vld [vmem:[#allocation5] ss:$8 sps:$4 sm:$0xff]  }
  0x2e   :  { %784 = vmatpush3.bf16.msra.mxu1 %v842_v23 }
  0x2f   :  { %752 = vmatpush3.bf16.msra.mxu0 %v832_v10  ;;  %785 = vmatprep.subr.bf16.mxu1 %v955_v0 }
  0x30   :  { %753 = vmatprep.subr.bf16.mxu0 %v833_v11  ;;  %v872_v11 = vld [vmem:[#allocation5 + $0x4] ss:$8 sps:$4 sm:$0xff]  }
  0x32   :  { %786 = vmatpush3.bf16.msra.mxu1 %v843_v25 }
  0x33   :  { %754 = vmatpush3.bf16.msra.mxu0 %v834_v15  ;;  %787 = vmatprep.subr.bf16.mxu1 %v955_v0  ;;  %v723_v15 = vld [vmem:[%s1107_s7] ss:$0 sm:$0xff] }
  0x34   :  { %755 = vmatprep.subr.bf16.mxu0 %v835_v16 }
  0x36   :  { %788 = vmatpush3.bf16.msra.mxu1 %v844_v26 }
  0x37   :  { %756 = vmatpush3.bf16.msra.mxu0 %v836_v18  ;;  %789 = vmatprep.subr.bf16.mxu1 %v955_v0 }
  0x38   :  { %757 = vmatprep.subr.bf16.mxu0 %v837_v19 }
  0x3a   :  { %790 = vmatpush3.bf16.msra.mxu1 %v845_v27  ;;  %v458_v27 = vld [vmem:[%s1109_s9] sm:$0x3] }
  0x3b   :  { %758 = vmatpush3.bf16.msra.mxu0 %v838_v21  ;;  %791 = vmatprep.subr.bf16.mxu1 %v955_v0 }
  0x3c   :  { %797 = vmatprep.subr.bf16.mxu0 %v955_v0 }
  0x3e   :  { %238 = vmatmul.mubr.bf16.vlgmr.msra.gmra.mxu0 %v68_v24  ;;  %792 = vmatpush3.bf16.msra.mxu1 %v846_v28  ;;  %v460_v24 = vlaneseq }
  0x3f   :  { %801 = vmatprep.mubr.msk.bf16.mxu0 %vm956_vm0, %v955_v0  ;;  %798 = vmatpush3.bf16.msra.mxu0 %v847_v39 }
  0x40   :  { %799 = vmatprep.subr.bf16.mxu0 %v955_v0  ;;  %550 = vmatprep.subr.bf16.mxu1 %v851_v54  ;;  %v858_v0 = vld [vmem:[#allocation5 + $0x40] ss:$8 sps:$4 sm:$0xff]   ;;  %v461_v25 = vshrl.u32 %v460_v24, 7 }
  0x42   :  { %v462_v26 = vsub.s32 0, %v461_v25  ;;  %v466_v28 = vsub.s32 1, %v461_v25 }
  0x43   :  { %800 = vmatpush3.bf16.msra.mxu0 %v848_v49 }
  0x44   :  { %v463_v29 = vrot.slane %v458_v27, %v462_v26 }
  0x9a   :  { %v364_v50 = vpop.permute.xlu0 %363 }
  0xfe   :  { %v759_v30 = vpop.f32.mrf.mxu0 }
 0x100   :  { %v760_v32 = vpop.f32.mrf.mxu0 }
 0x101   :  { %v761_v33 = vadd.f32 %v760_v32, %v759_v30  ;;  %v467_v30 = vrot.slane %v458_v27, %v466_v28 }
 0x102   :  { %v762_v34 = vpop.f32.mrf.mxu0 }
 0x103   :  { %v240_v35 = vadd.f32 %v761_v33, %v697_v31 }
 0x104   :  { %v763_v36 = vpop.f32.mrf.mxu0 }
 0x105   :  { %v245_v37 = vmax.f32 %v240_v35, 0.0 }
 0x107   :  { %v246_v38 = vpack.c.bf16 %v245_v37, %v245_v37 }
 0x109   :  { %794 = vmatmul.mubr.bf16.vlgmr.msra.gmra.mxu1 %v246_v38 }
 0x10a   :  { %551 = vmatpush1.bf16.msra.mxu1 %v849_v53  ;;  %582 = vmatprep.mubr.bf16.mxu1 %v959_v14 }
 0x10b   :  { %552 = vmatprep.subr.bf16.mxu1 %v854_v55 }
 0x10e   :  { %553 = vmatpush1.bf16.msra.mxu1 %v852_v56 }
 0x10f   :  { %554 = vmatprep.subr.bf16.mxu1 %v857_v57 }
 0x112   :  { %555 = vmatpush1.bf16.msra.mxu1 %v855_v58 }
 0x113   :  { %556 = vmatprep.subr.bf16.mxu1 %v860_v60 }
 0x116   :  { %557 = vmatpush1.bf16.msra.mxu1 %v858_v0 }
 0x117   :  { %558 = vmatprep.subr.bf16.mxu1 %v863_v2 }
 0x11a   :  { %559 = vmatpush1.bf16.msra.mxu1 %v861_v3 }
 0x11b   :  { %560 = vmatprep.subr.bf16.mxu1 %v866_v4 }
 0x11e   :  { %561 = vmatpush1.bf16.msra.mxu1 %v864_v5 }
 0x11f   :  { %562 = vmatprep.subr.bf16.mxu1 %v869_v6 }
 0x122   :  { %563 = vmatpush1.bf16.msra.mxu1 %v867_v7 }
 0x123   :  { %564 = vmatprep.subr.bf16.mxu1 %v872_v11 }
 0x126   :  { %565 = vmatpush1.bf16.msra.mxu1 %v870_v13 }
 0x1c9   :  { %v352_v41 = vpop.f32.mrf.mxu1 }
 0x1ca   :  { %v353_v42 = vadd.f32 %v714_v40, %v352_v41 }
 0x1cb   :  { %v795_v43 = vpop.f32.mrf.mxu1 }
 0x1cc   :  { %v358_v44 = vmul.f32 0.5, %v353_v42  ;;  %v656_v45 = vmul.f32 %v353_v42, %v353_v42  ;;  %v655_v59 = vadd.f32 1.0, %v353_v42 }
 0x1cd   :  { %v355_v46 = vpop.f32.mrf.mxu1 }
 0x1ce   :  { %v359_v47 = vmul.f32 1.442695, %v358_v44  ;;  %658 = vrot.lane.b32.xlu1 %v656_v45, %s957_s26 }
 0x1cf   :  { %v796_v48 = vpop.f32.mrf.mxu1 }
 0x1d0   :  { %873 = vpow2.f32 %v359_v47 }
 0x1dd   :  { %v874_v51 = vpop.eup %873 }
 0x1de   :  { %v366_v52 = vmul.f32 %v874_v51, %v364_v50  ;;  %v361_v62 = vmul.f32 %v874_v51, %v874_v51 }
 0x1e0   :  { %368 = vrot.lane.b32.xlu0 %v366_v52, %s958_s5 }
 0x240   :  { %v659_v61 = vpop.permute.xlu1 %658 }
 0x241   :  { %v661_v63 = vsub.f32 %v655_v59, %v659_v61 }
 0x243   :  { %v662_v1 = vsub.f32 %v661_v63, %v361_v62 }
 0x245   :  { %664 = vrot.lane.b32.xlu1 %v662_v1, %s958_s5 }
 0x252   :  { %v369_v8 = vpop.permute.xlu0 %368 }
 0x253   :  { %v371_v9 = vadd.f32 %v369_v8, %v353_v42 }
 0x255   :  { %v372_v10 = vpack.c.bf16 %v371_v9, %v371_v9 }
 0x257   :  { %802 = vmatmul.mubr.msk.bf16.vlgmr.msra.gmra.mxu0 %vm396_vm1, %v372_v10 }
 0x317   :  { %v434_v16 = vpop.f32.mrf.mxu0 }
 0x318   :  { %v435_v17 = vadd.f32 %v723_v15, %v434_v16  ;;  %v665_v16 = vpop.permute.xlu1 %664 }
 0x319   :  { %v803_v18 = vpop.f32.mrf.mxu0 }
 0x31a   :  { %v440_v19 = vmax.f32 %v435_v17, 0.0  ;;  %v667_v17 = vsel %vm396_vm1, %v665_v16, 0.0 }
 0x31b   :  { %v437_v20 = vpop.f32.mrf.mxu0 }
 0x31c   :  { %v441_v21 = vpack.c.bf16 %v440_v19, %v440_v19 }
 0x31d   :  { %v804_v23 = vpop.f32.mrf.mxu0 }
 0x31e   :  { %583 = vmatmul.mubr.bf16.vlgmr.msra.gmra.mxu1 %v441_v21 }
 0x3de   :  { %v584_v31 = vpop.f32.mrf.mxu1 }
 0x3df   :  { %v585_v32 = vadd.f32 %v584_v31, %v463_v29 }
 0x3e0   :  { %v586_v33 = vpop.f32.mrf.mxu1 }
 0x3e1   :  { %v593_v34 = vand.u32 2147483647, %v585_v32  ;;  %v587_v35 = vadd.f32 %v586_v33, %v467_v30  ;;  %v591_v57 = vmax.f32 %v585_v32, 0.0 }
 0x3e2   :  { %v588_v36 = vpop.f32.mrf.mxu1 }
 0x3e3   :  { %v595_v37 = vsub.f32 0.0, %v593_v34  ;;  %v594_v38 = vand.u32 2147483647, %v587_v35  ;;  %v592_v62 = vmax.f32 %v587_v35, 0.0 }
 0x3e4   :  { %v589_v39 = vpop.f32.mrf.mxu1 }
 0x3e5   :  { %v597_v40 = vmul.f32 1.442695, %v595_v37  ;;  %v596_v41 = vsub.f32 0.0, %v594_v38 }
 0x3e7   :  { %875 = vpow2.f32 %v597_v40  ;;  %v599_v42 = vmul.f32 1.442695, %v596_v41 }
 0x3e9   :  { %877 = vpow2.f32 %v599_v42 }
 0x3f4   :  { %v876_v43 = vpop.eup %875 }
 0x3f5   :  { %v601_v44 = vadd.f32 1.0, %v876_v43  ;;  %v604_v47 = vmul.f32 -0.5, %v876_v43  ;;  %v607_v50 = vand.u32 2147483647, %v876_v43 }
 0x3f6   :  { %v878_v45 = vpop.eup %877 }
 0x3f7   :  { %879 = vlog2.f32 %v601_v44  ;;  %v610_v46 = vadd.f32 1.0, %v878_v45  ;;  %v613_v48 = vmul.f32 -0.5, %v878_v45  ;;  %v605_v49 = vadd.f32 1.0, %v604_v47 }
 0x3f8   :  { %v616_v53 = vand.u32 2147483647, %v878_v45  ;;  %vm608_vm2 = vcmp.lt.f32.partialorder %v607_v50, 0.0004427343 }
 0x3f9   :  { %881 = vlog2.f32 %v610_v46  ;;  %v614_v51 = vadd.f32 1.0, %v613_v48  ;;  %v606_v55 = vmul.f32 %v876_v43, %v605_v49 }
 0x3fa   :  { %vm617_vm3 = vcmp.lt.f32.partialorder %v616_v53, 0.0004427343 }
 0x3fb   :  { %v615_v60 = vmul.f32 %v878_v45, %v614_v51 }
 0x404   :  { %v880_v52 = vpop.eup %879 }
 0x405   :  { %v603_v54 = vmul.f32 0.6931472, %v880_v52 }
 0x406   :  { %v882_v56 = vpop.eup %881 }
 0x407   :  { %v609_v58 = vsel %vm608_vm2, %v606_v55, %v603_v54  ;;  %v612_v59 = vmul.f32 0.6931472, %v882_v56 }
 0x408   :  { %v619_v61 = vadd.f32 %v609_v58, %v591_v57 }
 0x409   :  { %v618_v63 = vsel %vm617_vm3, %v615_v60, %v612_v59 }
 0x40a   :  { %v621_v0 = vsub.f32 %v585_v32, %v619_v61  ;;  %v620_v1 = vadd.f32 %v618_v63, %v592_v62  ;;  %v625_v2 = vsub.f32 0.0, %v619_v61 }
 0x40c   :  { %v623_v3 = vmax.f32 %v621_v0, -100.0  ;;  %v622_v4 = vsub.f32 %v587_v35, %v620_v1  ;;  %v626_v5 = vsub.f32 0.0, %v620_v1  ;;  %v627_v6 = vmax.f32 %v625_v2, -100.0 }
 0x40e   :  { %v624_v7 = vmax.f32 %v622_v4, -100.0  ;;  %v628_v8 = vmax.f32 %v626_v5, -100.0  ;;  %v629_v9 = vsub.f32 %v623_v3, %v627_v6 }
 0x410   :  { %v643_v10 = vadd.f32 %v628_v8, %v627_v6  ;;  %v630_v11 = vsub.f32 %v624_v7, %v628_v8  ;;  %v631_v13 = vmul.f32 %v629_v9, %v1043_v22 }
 0x412   :  { %644 = vadd.xlane.f32.xlu1 %v643_v10  ;;  %v632_v14 = vmul.f32 %v630_v11, %v1026_v12 }
 0x414   :  { %v633_v15 = vadd.f32 %v632_v14, %v631_v13 }
 0x416   :  { %634 = vadd.xlane.f32.xlu0 %v633_v15 }
 0x41a   :  { %668 = vadd.xlane.f32.xlu0 %v667_v17 }
 0x49b   :  { %v645_v18 = vpop.xlane.xlu1 %644 }
 0x49c   :  { %v646_v19 = vrot.slane %v645_v18, 4 }
 0x49e   :  { %v647_v20 = vadd.f32 %v646_v19, %v645_v18 }
 0x49f   :  { %v635_v21 = vpop.xlane.xlu0 %634 }
 0x4a0   :  { %v648_v23 = vrot.slane %v647_v20, 2  ;;  %v636_v24 = vrot.slane %v635_v21, 4 }
 0x4a2   :  { %v637_v25 = vadd.f32 %v636_v24, %v635_v21  ;;  %v649_v26 = vadd.f32 %v648_v23, %v647_v20 }
 0x4a3   :  { %v669_v27 = vpop.xlane.xlu0 %668 }
 0x4a4   :  { %v638_v28 = vrot.slane %v637_v25, 2  ;;  %v670_v29 = vrot.slane %v669_v27, 4  ;;  %v650_v12 = vrot.slane %v649_v26, 1 }
 0x4a6   :  { %v671_v22 = vadd.f32 %v670_v29, %v669_v27  ;;  %v639_v30 = vadd.f32 %v638_v28, %v637_v25  ;;  %v651_v35 = vadd.f32 %v650_v12, %v649_v26 }
 0x4a8   :  { %v672_v31 = vrot.slane %v671_v22, 2  ;;  %v640_v32 = vrot.slane %v639_v30, 1 }
 0x4aa   :  { %v673_v33 = vadd.f32 %v672_v31, %v671_v22  ;;  %v641_v34 = vadd.f32 %v640_v32, %v639_v30 }
 0x4ac   :  { %805 = vpush %v641_v34  ;;  %v674_v36 = vrot.slane %v673_v33, 1 }
 0x4ad   :  { %807 = vpush %v651_v35 }
 0x4ae   :  { %v675_v37 = vadd.f32 %v674_v36, %v673_v33 }
 0x4b0   :  { %809 = vpush %v675_v37 }
 0x4dd   :  { %s806_s7 = spop %805 }
 0x4de   :  { %s808_s9 = spop %807 }
 0x4df   :  { %s653_s13 = sadd.f32 %s808_s9, %s806_s7 }
 0x4e1   :  { %s810_s14 = spop %809  ;;  %s654_s17 = ssub.f32 0.0, %s653_s13 }
 0x4e2   :  { %s677_s18 = smul.f32 -0.5, %s810_s14 }
 0x4e4   :  { %s678_s0 = sadd.f32 %s677_s18, %s654_s17 }
 0x4e6   :  { %v679_v38 = vstv %s678_s0 }
 0x4e7   :  { %680 = vst [vmem:[#allocation7] sm:$0x1] %v679_v38 }
 0x4e8   :  { %934 = shalt.err (!%p931_p0)
}
 0x4e9   :  { %690 = dma.vmem_to_hbm [thread:$0]  %s688_s16, 16, %s1110_s10, [#allocation4]  }
 0x4ea   :  { %947 = dma.done.wait [#allocation4], 16  }
 0x4eb   :  { %948 = vsyncadd [#allocation4], 4294967280 }
 0x4ec   :  { %694 = vsyncpa [#allocation3], 1 }
 0x4ed   :  { %695 = vsyncpa [#allocation6], 1 }
 0x4ee   :  { %696 = vsyncpa [#allocation4], 1 }

</bundles_post_ra>
